<compile_context>
chip_gen: v6e
topology: v6e:2x2x1
jax: 0.10.0
libtpu: 0.0.40
codegen_flags: <defaults>
</compile_context>

<pallas_src>
import math
import functools

import jax
import jax.numpy as jnp
from jax import lax
from jax.experimental import pallas as pl
from jax.experimental.pallas import tpu as pltpu

MAX_TOKENS = 100  # max_tokens_during_train
LANE = 128

VMEM_SPEC = pl.BlockSpec(memory_space=pltpu.MemorySpace.VMEM)


def _round_up(n, m):
    return ((n + m - 1) // m) * m


# -----------------------------------------------------------------------------
# Kernel A: fused features_attn_head + TransformerEncoder(depth=1, heads=1)
#           + [:max_tokens] + positional encoding + hoisted LSTM input proj.
# One grid step per batch element.
# -----------------------------------------------------------------------------
def _ctx_gates_kernel(x_ref, wp_ref, bp_ref,
                      wqkv_ref, bqkv_ref, wo_ref, bo_ref,
                      g1_ref, be1_ref, w1_ref, bf1_ref, w2_ref, bf2_ref,
                      g2_ref, be2_ref,
                      pe_ref, wih_ref, bih_ref,
                      gates_ref, *, n_tokens):
    D = wp_ref.shape[1]

    # features_attn_head = Sequential(ReLU(), Linear(E, D))
    x = jnp.maximum(x_ref[0], 0.0)                                        # [S, E]
    h = jnp.dot(x, wp_ref[...], preferred_element_type=jnp.float32) + bp_ref[...]

    # --- TransformerEncoderLayer (nhead=1, dim_ff=D, relu, post-LN, eval) ---
    qkv = (jnp.dot(h, wqkv_ref[...], preferred_element_type=jnp.float32)
           + bqkv_ref[...])                                               # [S, 3D]
    q = qkv[:, 0:D]
    k = qkv[:, D:2 * D]
    v = qkv[:, 2 * D:3 * D]

    s = lax.dot_general(q, k, (((1,), (1,)), ((), ())),
                        preferred_element_type=jnp.float32) * (1.0 / math.sqrt(D))
    s = s - jnp.max(s, axis=-1, keepdims=True)
    p = jnp.exp(s)
    p = p * pl.reciprocal(jnp.sum(p, axis=-1, keepdims=True), approx=True)
    attn = jnp.dot(p, v, preferred_element_type=jnp.float32)
    attn = (jnp.dot(attn, wo_ref[...], preferred_element_type=jnp.float32)
            + bo_ref[...])

    h = h + attn
    mu = jnp.mean(h, axis=-1, keepdims=True)
    var = jnp.mean((h - mu) ** 2, axis=-1, keepdims=True)
    h = (h - mu) * lax.rsqrt(var + 1e-5) * g1_ref[...] + be1_ref[...]

    f = jnp.dot(h, w1_ref[...], preferred_element_type=jnp.float32) + bf1_ref[...]
    f = jnp.maximum(f, 0.0)
    f = jnp.dot(f, w2_ref[...], preferred_element_type=jnp.float32) + bf2_ref[...]

    h = h + f
    mu = jnp.mean(h, axis=-1, keepdims=True)
    var = jnp.mean((h - mu) ** 2, axis=-1, keepdims=True)
    h = (h - mu) * lax.rsqrt(var + 1e-5) * g2_ref[...] + be2_ref[...]     # [S, D]

    # .transpose(1, 0)[:max_tokens] handled by layout: take first T tokens here,
    # add positional encoding (pos_emb with dropout=0), then hoist X @ W_ih.
    xt = h[0:n_tokens, :] + pe_ref[...]                                   # [T, D]
    gates_ref[0] = (jnp.dot(xt, wih_ref[...], preferred_element_type=jnp.float32)
                    + bih_ref[...])                                       # [T, 4D]


def _full_spec(a):
    nd = a.ndim
    return pl.BlockSpec(a.shape, lambda b: (0,) * nd)


def ctx_gates(features, params, pe, n_tokens):
    B, S, E = features.shape
    D = params['w_proj'].shape[1]
    tp = params['tfm']
    weights = (params['w_proj'], params['b_proj'],
               tp['wqkv'], tp['bqkv'], tp['wo'], tp['bo'],
               tp['g1'], tp['be1'], tp['w1'], tp['bf1'], tp['w2'], tp['bf2'],
               tp['g2'], tp['be2'],
               pe, params['w_ih'], params['b_lstm'])
    in_specs = ([pl.BlockSpec((1, S, E), lambda b: (b, 0, 0))]
                + [_full_spec(a) for a in weights])
    return pl.pallas_call(
        functools.partial(_ctx_gates_kernel, n_tokens=n_tokens),
        out_shape=jax.ShapeDtypeStruct((B, n_tokens, 4 * D), jnp.float32),
        grid=(B,),
        in_specs=in_specs,
        out_specs=pl.BlockSpec((1, n_tokens, 4 * D), lambda b: (b, 0, 0)),
        compiler_params=pltpu.CompilerParams(dimension_semantics=("parallel",)),
    )(features, *weights)


# -----------------------------------------------------------------------------
# Kernel B: LSTM recurrence (single kernel invocation, fori_loop over time) with
# the lm_head fused in.  Only h @ W_hh + gate nonlinearities remain on the
# serial path.  PyTorch gate order: i, f, g, o.  b = b_ih + b_hh folded
# (precomputed into the gates input by kernel A).  The lm_head weight passed
# here is lane-padded so the per-step logits store is a full-lane `vst`.
# -----------------------------------------------------------------------------
def _lstm_lm_kernel(gates_ref, whh_ref, h0_ref, c0_ref, wlm_ref, blm_ref,
                    logits_ref, hT_ref, cT_ref):
    T = gates_ref.shape[0]
    D = h0_ref.shape[-1]

    # Loop-invariant weights: load once, stay resident in vregs.
    whh = whh_ref[...]
    wlm = wlm_ref[...]
    blm = blm_ref[...]

    def step(t, carry):
        h, c = carry
        gates = gates_ref[t] + jnp.dot(h, whh,
                                       preferred_element_type=jnp.float32)  # [B, 4D]
        i = jax.nn.sigmoid(gates[:, 0:D])
        f = jax.nn.sigmoid(gates[:, D:2 * D])
        g = jnp.tanh(gates[:, 2 * D:3 * D])
        o = jax.nn.sigmoid(gates[:, 3 * D:4 * D])
        c_new = f * c + i * g
        h_new = o * jnp.tanh(c_new)
        # lm_head fused per step (off the recurrent dependency chain).
        logits_ref[t] = (jnp.dot(h_new, wlm, preferred_element_type=jnp.float32)
                         + blm)
        return (h_new, c_new)

    hT, cT = lax.fori_loop(0, T, step, (h0_ref[...], c0_ref[...]))
    hT_ref[...] = hT
    cT_ref[...] = cT


def lstm_lm(gates_tbg, w_hh, h0, c0, w_lm_p, b_lm_p):
    T, B, _ = gates_tbg.shape
    D = w_hh.shape[0]
    Vp = w_lm_p.shape[1]
    return pl.pallas_call(
        _lstm_lm_kernel,
        out_shape=(jax.ShapeDtypeStruct((T, B, Vp), jnp.float32),
                   jax.ShapeDtypeStruct((B, D), jnp.float32),
                   jax.ShapeDtypeStruct((B, D), jnp.float32)),
        in_specs=[VMEM_SPEC] * 6,
        out_specs=(VMEM_SPEC, VMEM_SPEC, VMEM_SPEC),
    )(gates_tbg, w_hh, h0, c0, w_lm_p, b_lm_p)


# -----------------------------------------------------------------------------
# Parameters / glue
# -----------------------------------------------------------------------------
def init_params(key, E, D, V):
    ks = jax.random.split(key, 16)
    s = 0.1
    return {
        'w_proj': jax.random.normal(ks[0], (E, D), jnp.float32) * s,
        'b_proj': jax.random.normal(ks[1], (1, D), jnp.float32) * s,
        'tfm': {
            'wqkv': jax.random.normal(ks[2], (D, 3 * D), jnp.float32) * s,
            'bqkv': jax.random.normal(ks[3], (1, 3 * D), jnp.float32) * s,
            'wo': jax.random.normal(ks[4], (D, D), jnp.float32) * s,
            'bo': jax.random.normal(ks[5], (1, D), jnp.float32) * s,
            'g1': jnp.ones((1, D), jnp.float32),
            'be1': jnp.zeros((1, D), jnp.float32),
            'w1': jax.random.normal(ks[6], (D, D), jnp.float32) * s,   # dim_ff == D
            'bf1': jax.random.normal(ks[7], (1, D), jnp.float32) * s,
            'w2': jax.random.normal(ks[8], (D, D), jnp.float32) * s,
            'bf2': jax.random.normal(ks[9], (1, D), jnp.float32) * s,
            'g2': jnp.ones((1, D), jnp.float32),
            'be2': jnp.zeros((1, D), jnp.float32),
        },
        'init_states': jax.random.normal(ks[10], (2, D), jnp.float32),  # Embedding(2, D)
        'w_ih': jax.random.normal(ks[11], (D, 4 * D), jnp.float32) * s,  # W_ih^T
        'w_hh': jax.random.normal(ks[12], (D, 4 * D), jnp.float32) * s,  # W_hh^T
        'b_lstm': jax.random.normal(ks[13], (1, 4 * D), jnp.float32) * s,  # b_ih+b_hh
        'w_lm': jax.random.normal(ks[14], (D, V), jnp.float32) * s,
        'b_lm': jax.random.normal(ks[15], (1, V), jnp.float32) * s,
    }


def positional_encoding(T, D):
    position = jnp.arange(T, dtype=jnp.float32)[:, None]
    div_term = jnp.exp(jnp.arange(0, D, 2, dtype=jnp.float32)
                       * (-math.log(10000.0) / D))
    pe = jnp.zeros((T, D), dtype=jnp.float32)
    pe = pe.at[:, 0::2].set(jnp.sin(position * div_term))
    pe = pe.at[:, 1::2].set(jnp.cos(position * div_term))
    return pe                                              # [T, D]


def lstm_decoder_with_attention_forward(params, features):
    # TODO(synk): the wrapped `encoder` is external to this module; `features`
    # is consumed directly as encoder(batch)['features'] (identity encoder),
    # and all Dropout layers use eval semantics (no-op).
    B, S, E = features.shape
    D = params['w_proj'].shape[1]
    V = params['w_lm'].shape[1]
    T = min(S, MAX_TOKENS)

    pe = positional_encoding(T, D)

    # Kernel A: proj + transformer + pe + hoisted W_ih projection.
    gates_btg = ctx_gates(features, params, pe, T)          # [B, T, 4D]
    # Tiny layout glue: time-major gates for the serial recurrence.
    gates_tbg = jnp.transpose(gates_btg, (1, 0, 2))         # [T, B, 4D]

    # initial_states(0) -> h0, initial_states(1) -> c0
    h0 = jnp.broadcast_to(params['init_states'][0], (B, D))
    c0 = jnp.broadcast_to(params['init_states'][1], (B, D))

    # Pad vocab dim to a lane multiple so in-kernel logits stores are unmasked.
    Vp = _round_up(V, LANE)
    if Vp != V:
        w_lm_p = jnp.pad(params['w_lm'], ((0, 0), (0, Vp - V)))
        b_lm_p = jnp.pad(params['b_lm'], ((0, 0), (0, Vp - V)))
    else:
        w_lm_p, b_lm_p = params['w_lm'], params['b_lm']

    # Kernel B: whole LSTM recurrence + lm_head in one kernel invocation.
    logits_p, hT, cT = lstm_lm(gates_tbg, params['w_hh'], h0, c0,
                               w_lm_p, b_lm_p)               # [T,B,Vp],[B,D],[B,D]
    logits = logits_p[..., :V]                               # [T, B, V]

    generated = jnp.argmax(logits, axis=-1).T                # [B, T] (tiny XLA glue)

    return {
        'features': features,
        'language_head_output': logits,
        'generated_sequence': generated,
        'hidden_states': (hT[None], cT[None]),
    }


if __name__ == "__main__":
    B, S, E, D, V = 2, 8, 16, 32, 64  # batch, seq, encoder_input, token_size, vocab
    key = jax.random.PRNGKey(0)
    k_feat, k_param = jax.random.split(key)

    features = jax.random.normal(k_feat, (B, S, E), dtype=jnp.float32)
    params = init_params(k_param, E, D, V)

    out = jax.jit(lstm_decoder_with_attention_forward)(params, features)
    out = jax.block_until_ready(out)

    T = min(S, MAX_TOKENS)
    assert out['language_head_output'].shape == (T, B, V)
    assert out['generated_sequence'].shape == (B, T)
    assert out['hidden_states'][0].shape == (1, B, D)
    assert out['hidden_states'][1].shape == (1, B, D)
    assert bool(jnp.all(jnp.isfinite(out['language_head_output'])))
    print("KERNEL_OK")
</pallas_src>

<mosaic_0001>
module attributes {stable_mosaic.version = 11 : i64} {
  func.func @_ctx_gates_kernel(%arg0: i32, %arg1: memref<1x8x16xf32, #tpu.memory_space<vmem>>, %arg2: memref<16x32xf32, #tpu.memory_space<vmem>>, %arg3: memref<1x32xf32, #tpu.memory_space<vmem>>, %arg4: memref<32x96xf32, #tpu.memory_space<vmem>>, %arg5: memref<1x96xf32, #tpu.memory_space<vmem>>, %arg6: memref<32x32xf32, #tpu.memory_space<vmem>>, %arg7: memref<1x32xf32, #tpu.memory_space<vmem>>, %arg8: memref<1x32xf32, #tpu.memory_space<vmem>>, %arg9: memref<1x32xf32, #tpu.memory_space<vmem>>, %arg10: memref<32x32xf32, #tpu.memory_space<vmem>>, %arg11: memref<1x32xf32, #tpu.memory_space<vmem>>, %arg12: memref<32x32xf32, #tpu.memory_space<vmem>>, %arg13: memref<1x32xf32, #tpu.memory_space<vmem>>, %arg14: memref<1x32xf32, #tpu.memory_space<vmem>>, %arg15: memref<1x32xf32, #tpu.memory_space<vmem>>, %arg16: memref<8x32xf32, #tpu.memory_space<vmem>>, %arg17: memref<32x128xf32, #tpu.memory_space<vmem>>, %arg18: memref<1x128xf32, #tpu.memory_space<vmem>>, %arg19: memref<1x8x128xf32, #tpu.memory_space<vmem>>) attributes {dimension_semantics = [#tpu.dimension_semantics<parallel>], iteration_bounds = array<i64: 2>, scalar_prefetch = 0 : i64, scratch_operands = 0 : i64, tpu.core_type = #tpu.core_type<tc>, window_params = [{transform_indices = @transform_0, window_bounds = array<i64: 1, 8, 16>}, {pipeline_mode = #tpu.pipeline_mode<synchronous>, transform_indices = @transform_1, window_bounds = array<i64: 16, 32>}, {pipeline_mode = #tpu.pipeline_mode<synchronous>, transform_indices = @transform_2, window_bounds = array<i64: 1, 32>}, {pipeline_mode = #tpu.pipeline_mode<synchronous>, transform_indices = @transform_3, window_bounds = array<i64: 32, 96>}, {pipeline_mode = #tpu.pipeline_mode<synchronous>, transform_indices = @transform_4, window_bounds = array<i64: 1, 96>}, {pipeline_mode = #tpu.pipeline_mode<synchronous>, transform_indices = @transform_5, window_bounds = array<i64: 32, 32>}, {pipeline_mode = #tpu.pipeline_mode<synchronous>, transform_indices = @transform_6, window_bounds = array<i64: 1, 32>}, {pipeline_mode = #tpu.pipeline_mode<synchronous>, transform_indices = @transform_7, window_bounds = array<i64: 1, 32>}, {pipeline_mode = #tpu.pipeline_mode<synchronous>, transform_indices = @transform_8, window_bounds = array<i64: 1, 32>}, {pipeline_mode = #tpu.pipeline_mode<synchronous>, transform_indices = @transform_9, window_bounds = array<i64: 32, 32>}, {pipeline_mode = #tpu.pipeline_mode<synchronous>, transform_indices = @transform_10, window_bounds = array<i64: 1, 32>}, {pipeline_mode = #tpu.pipeline_mode<synchronous>, transform_indices = @transform_11, window_bounds = array<i64: 32, 32>}, {pipeline_mode = #tpu.pipeline_mode<synchronous>, transform_indices = @transform_12, window_bounds = array<i64: 1, 32>}, {pipeline_mode = #tpu.pipeline_mode<synchronous>, transform_indices = @transform_13, window_bounds = array<i64: 1, 32>}, {pipeline_mode = #tpu.pipeline_mode<synchronous>, transform_indices = @transform_14, window_bounds = array<i64: 1, 32>}, {pipeline_mode = #tpu.pipeline_mode<synchronous>, transform_indices = @transform_15, window_bounds = array<i64: 8, 32>}, {pipeline_mode = #tpu.pipeline_mode<synchronous>, transform_indices = @transform_16, window_bounds = array<i64: 32, 128>}, {pipeline_mode = #tpu.pipeline_mode<synchronous>, transform_indices = @transform_17, window_bounds = array<i64: 1, 128>}, {transform_indices = @transform_18, window_bounds = array<i64: 1, 8, 128>}]} {
    %c0 = arith.constant 0 : index
    %c0_0 = arith.constant 0 : index
    %c0_1 = arith.constant 0 : index
    %0 = vector.load %arg1[%c0, %c0_0, %c0_1] : memref<1x8x16xf32, #tpu.memory_space<vmem>>, vector<1x8x16xf32>
    %1 = vector.shape_cast %0 : vector<1x8x16xf32> to vector<8x16xf32>
    %cst = arith.constant 0.000000e+00 : f32
    %2 = vector.broadcast %cst : f32 to vector<8x16xf32>
    %3 = arith.maximumf %1, %2 : vector<8x16xf32>
    %c0_2 = arith.constant 0 : index
    %c0_3 = arith.constant 0 : index
    %4 = vector.load %arg2[%c0_2, %c0_3] : memref<16x32xf32, #tpu.memory_space<vmem>>, vector<16x32xf32>
    %cst_4 = arith.constant dense<0.000000e+00> : vector<8x32xf32>
    %5 = tpu.matmul %3, %4, %cst_4 {dimension_numbers = #tpu.dot_dimension_numbers<[1], [0], [0], [1], [0, 0, 1, 1], [], []>} : vector<8x16xf32>, vector<16x32xf32>, vector<8x32xf32> -> vector<8x32xf32>
    %c0_5 = arith.constant 0 : index
    %c0_6 = arith.constant 0 : index
    %6 = vector.load %arg3[%c0_5, %c0_6] : memref<1x32xf32, #tpu.memory_space<vmem>>, vector<1x32xf32>
    %7 = vector.broadcast %6 : vector<1x32xf32> to vector<8x32xf32>
    %8 = arith.addf %5, %7 : vector<8x32xf32>
    %c0_7 = arith.constant 0 : index
    %c0_8 = arith.constant 0 : index
    %9 = vector.load %arg4[%c0_7, %c0_8] : memref<32x96xf32, #tpu.memory_space<vmem>>, vector<32x96xf32>
    %cst_9 = arith.constant dense<0.000000e+00> : vector<8x96xf32>
    %10 = tpu.matmul %8, %9, %cst_9 {dimension_numbers = #tpu.dot_dimension_numbers<[1], [0], [0], [1], [0, 0, 1, 1], [], []>} : vector<8x32xf32>, vector<32x96xf32>, vector<8x96xf32> -> vector<8x96xf32>
    %c0_10 = arith.constant 0 : index
    %c0_11 = arith.constant 0 : index
    %11 = vector.load %arg5[%c0_10, %c0_11] : memref<1x96xf32, #tpu.memory_space<vmem>>, vector<1x96xf32>
    %12 = vector.broadcast %11 : vector<1x96xf32> to vector<8x96xf32>
    %13 = arith.addf %10, %12 : vector<8x96xf32>
    %14 = vector.extract_strided_slice %13 {offsets = [0, 0], sizes = [8, 32], strides = [1, 1]} : vector<8x96xf32> to vector<8x32xf32>
    %15 = vector.extract_strided_slice %13 {offsets = [0, 32], sizes = [8, 32], strides = [1, 1]} : vector<8x96xf32> to vector<8x32xf32>
    %16 = vector.extract_strided_slice %13 {offsets = [0, 64], sizes = [8, 32], strides = [1, 1]} : vector<8x96xf32> to vector<8x32xf32>
    %cst_12 = arith.constant dense<0.000000e+00> : vector<8x8xf32>
    %17 = tpu.matmul %14, %15, %cst_12 {dimension_numbers = #tpu.dot_dimension_numbers<[1], [1], [0], [0], [0, 0, 1, 0], [], []>} : vector<8x32xf32>, vector<8x32xf32>, vector<8x8xf32> -> vector<8x8xf32>
    %cst_13 = arith.constant 0.176776692 : f32
    %18 = vector.broadcast %cst_13 : f32 to vector<8x8xf32>
    %19 = arith.mulf %17, %18 : vector<8x8xf32>
    %cst_14 = arith.constant dense<0xFF800000> : vector<8xf32>
    %20 = vector.multi_reduction <maximumf>, %19, %cst_14 [1] : vector<8x8xf32> to vector<8xf32>
    %21 = vector.shape_cast %20 : vector<8xf32> to vector<8x1xf32>
    %22 = vector.broadcast %21 : vector<8x1xf32> to vector<8x8xf32>
    %23 = arith.subf %19, %22 : vector<8x8xf32>
    %24 = math.exp %23 : vector<8x8xf32>
    %cst_15 = arith.constant dense<0.000000e+00> : vector<8xf32>
    %25 = vector.multi_reduction <add>, %24, %cst_15 [1] : vector<8x8xf32> to vector<8xf32>
    %26 = vector.shape_cast %25 : vector<8xf32> to vector<8x1xf32>
    %27 = tpu.reciprocal %26 {approx = true} : vector<8x1xf32> -> vector<8x1xf32>
    %28 = vector.broadcast %27 : vector<8x1xf32> to vector<8x8xf32>
    %29 = arith.mulf %24, %28 : vector<8x8xf32>
    %cst_16 = arith.constant dense<0.000000e+00> : vector<8x32xf32>
    %30 = tpu.matmul %29, %16, %cst_16 {dimension_numbers = #tpu.dot_dimension_numbers<[1], [0], [0], [1], [0, 0, 1, 1], [], []>} : vector<8x8xf32>, vector<8x32xf32>, vector<8x32xf32> -> vector<8x32xf32>
    %c0_17 = arith.constant 0 : index
    %c0_18 = arith.constant 0 : index
    %31 = vector.load %arg6[%c0_17, %c0_18] : memref<32x32xf32, #tpu.memory_space<vmem>>, vector<32x32xf32>
    %cst_19 = arith.constant dense<0.000000e+00> : vector<8x32xf32>
    %32 = tpu.matmul %30, %31, %cst_19 {dimension_numbers = #tpu.dot_dimension_numbers<[1], [0], [0], [1], [0, 0, 1, 1], [], []>} : vector<8x32xf32>, vector<32x32xf32>, vector<8x32xf32> -> vector<8x32xf32>
    %c0_20 = arith.constant 0 : index
    %c0_21 = arith.constant 0 : index
    %33 = vector.load %arg7[%c0_20, %c0_21] : memref<1x32xf32, #tpu.memory_space<vmem>>, vector<1x32xf32>
    %34 = vector.broadcast %33 : vector<1x32xf32> to vector<8x32xf32>
    %35 = arith.addf %32, %34 : vector<8x32xf32>
    %36 = arith.addf %8, %35 : vector<8x32xf32>
    %cst_22 = arith.constant dense<0.000000e+00> : vector<8xf32>
    %37 = vector.multi_reduction <add>, %36, %cst_22 [1] : vector<8x32xf32> to vector<8xf32>
    %38 = vector.shape_cast %37 : vector<8xf32> to vector<8x1xf32>
    %cst_23 = arith.constant 3.200000e+01 : f32
    %39 = vector.broadcast %cst_23 : f32 to vector<8x1xf32>
    %40 = arith.divf %38, %39 : vector<8x1xf32>
    %41 = vector.broadcast %40 : vector<8x1xf32> to vector<8x32xf32>
    %42 = arith.subf %36, %41 : vector<8x32xf32>
    %43 = arith.mulf %42, %42 : vector<8x32xf32>
    %cst_24 = arith.constant dense<0.000000e+00> : vector<8xf32>
    %44 = vector.multi_reduction <add>, %43, %cst_24 [1] : vector<8x32xf32> to vector<8xf32>
    %45 = vector.shape_cast %44 : vector<8xf32> to vector<8x1xf32>
    %cst_25 = arith.constant 3.200000e+01 : f32
    %46 = vector.broadcast %cst_25 : f32 to vector<8x1xf32>
    %47 = arith.divf %45, %46 : vector<8x1xf32>
    %48 = vector.broadcast %40 : vector<8x1xf32> to vector<8x32xf32>
    %49 = arith.subf %36, %48 : vector<8x32xf32>
    %cst_26 = arith.constant 9.99999974E-6 : f32
    %50 = vector.broadcast %cst_26 : f32 to vector<8x1xf32>
    %51 = arith.addf %47, %50 : vector<8x1xf32>
    %52 = math.rsqrt %51 : vector<8x1xf32>
    %53 = vector.broadcast %52 : vector<8x1xf32> to vector<8x32xf32>
    %54 = arith.mulf %49, %53 : vector<8x32xf32>
    %c0_27 = arith.constant 0 : index
    %c0_28 = arith.constant 0 : index
    %55 = vector.load %arg8[%c0_27, %c0_28] : memref<1x32xf32, #tpu.memory_space<vmem>>, vector<1x32xf32>
    %56 = vector.broadcast %55 : vector<1x32xf32> to vector<8x32xf32>
    %57 = arith.mulf %54, %56 : vector<8x32xf32>
    %c0_29 = arith.constant 0 : index
    %c0_30 = arith.constant 0 : index
    %58 = vector.load %arg9[%c0_29, %c0_30] : memref<1x32xf32, #tpu.memory_space<vmem>>, vector<1x32xf32>
    %59 = vector.broadcast %58 : vector<1x32xf32> to vector<8x32xf32>
    %60 = arith.addf %57, %59 : vector<8x32xf32>
    %c0_31 = arith.constant 0 : index
    %c0_32 = arith.constant 0 : index
    %61 = vector.load %arg10[%c0_31, %c0_32] : memref<32x32xf32, #tpu.memory_space<vmem>>, vector<32x32xf32>
    %cst_33 = arith.constant dense<0.000000e+00> : vector<8x32xf32>
    %62 = tpu.matmul %60, %61, %cst_33 {dimension_numbers = #tpu.dot_dimension_numbers<[1], [0], [0], [1], [0, 0, 1, 1], [], []>} : vector<8x32xf32>, vector<32x32xf32>, vector<8x32xf32> -> vector<8x32xf32>
    %c0_34 = arith.constant 0 : index
    %c0_35 = arith.constant 0 : index
    %63 = vector.load %arg11[%c0_34, %c0_35] : memref<1x32xf32, #tpu.memory_space<vmem>>, vector<1x32xf32>
    %64 = vector.broadcast %63 : vector<1x32xf32> to vector<8x32xf32>
    %65 = arith.addf %62, %64 : vector<8x32xf32>
    %cst_36 = arith.constant 0.000000e+00 : f32
    %66 = vector.broadcast %cst_36 : f32 to vector<8x32xf32>
    %67 = arith.maximumf %65, %66 : vector<8x32xf32>
    %c0_37 = arith.constant 0 : index
    %c0_38 = arith.constant 0 : index
    %68 = vector.load %arg12[%c0_37, %c0_38] : memref<32x32xf32, #tpu.memory_space<vmem>>, vector<32x32xf32>
    %cst_39 = arith.constant dense<0.000000e+00> : vector<8x32xf32>
    %69 = tpu.matmul %67, %68, %cst_39 {dimension_numbers = #tpu.dot_dimension_numbers<[1], [0], [0], [1], [0, 0, 1, 1], [], []>} : vector<8x32xf32>, vector<32x32xf32>, vector<8x32xf32> -> vector<8x32xf32>
    %c0_40 = arith.constant 0 : index
    %c0_41 = arith.constant 0 : index
    %70 = vector.load %arg13[%c0_40, %c0_41] : memref<1x32xf32, #tpu.memory_space<vmem>>, vector<1x32xf32>
    %71 = vector.broadcast %70 : vector<1x32xf32> to vector<8x32xf32>
    %72 = arith.addf %69, %71 : vector<8x32xf32>
    %73 = arith.addf %60, %72 : vector<8x32xf32>
    %cst_42 = arith.constant dense<0.000000e+00> : vector<8xf32>
    %74 = vector.multi_reduction <add>, %73, %cst_42 [1] : vector<8x32xf32> to vector<8xf32>
    %75 = vector.shape_cast %74 : vector<8xf32> to vector<8x1xf32>
    %cst_43 = arith.constant 3.200000e+01 : f32
    %76 = vector.broadcast %cst_43 : f32 to vector<8x1xf32>
    %77 = arith.divf %75, %76 : vector<8x1xf32>
    %78 = vector.broadcast %77 : vector<8x1xf32> to vector<8x32xf32>
    %79 = arith.subf %73, %78 : vector<8x32xf32>
    %80 = arith.mulf %79, %79 : vector<8x32xf32>
    %cst_44 = arith.constant dense<0.000000e+00> : vector<8xf32>
    %81 = vector.multi_reduction <add>, %80, %cst_44 [1] : vector<8x32xf32> to vector<8xf32>
    %82 = vector.shape_cast %81 : vector<8xf32> to vector<8x1xf32>
    %cst_45 = arith.constant 3.200000e+01 : f32
    %83 = vector.broadcast %cst_45 : f32 to vector<8x1xf32>
    %84 = arith.divf %82, %83 : vector<8x1xf32>
    %85 = vector.broadcast %77 : vector<8x1xf32> to vector<8x32xf32>
    %86 = arith.subf %73, %85 : vector<8x32xf32>
    %cst_46 = arith.constant 9.99999974E-6 : f32
    %87 = vector.broadcast %cst_46 : f32 to vector<8x1xf32>
    %88 = arith.addf %84, %87 : vector<8x1xf32>
    %89 = math.rsqrt %88 : vector<8x1xf32>
    %90 = vector.broadcast %89 : vector<8x1xf32> to vector<8x32xf32>
    %91 = arith.mulf %86, %90 : vector<8x32xf32>
    %c0_47 = arith.constant 0 : index
    %c0_48 = arith.constant 0 : index
    %92 = vector.load %arg14[%c0_47, %c0_48] : memref<1x32xf32, #tpu.memory_space<vmem>>, vector<1x32xf32>
    %93 = vector.broadcast %92 : vector<1x32xf32> to vector<8x32xf32>
    %94 = arith.mulf %91, %93 : vector<8x32xf32>
    %c0_49 = arith.constant 0 : index
    %c0_50 = arith.constant 0 : index
    %95 = vector.load %arg15[%c0_49, %c0_50] : memref<1x32xf32, #tpu.memory_space<vmem>>, vector<1x32xf32>
    %96 = vector.broadcast %95 : vector<1x32xf32> to vector<8x32xf32>
    %97 = arith.addf %94, %96 : vector<8x32xf32>
    %c0_51 = arith.constant 0 : index
    %c0_52 = arith.constant 0 : index
    %98 = vector.load %arg16[%c0_51, %c0_52] : memref<8x32xf32, #tpu.memory_space<vmem>>, vector<8x32xf32>
    %99 = arith.addf %97, %98 : vector<8x32xf32>
    %c0_53 = arith.constant 0 : index
    %c0_54 = arith.constant 0 : index
    %100 = vector.load %arg17[%c0_53, %c0_54] : memref<32x128xf32, #tpu.memory_space<vmem>>, vector<32x128xf32>
    %cst_55 = arith.constant dense<0.000000e+00> : vector<8x128xf32>
    %101 = tpu.matmul %99, %100, %cst_55 {dimension_numbers = #tpu.dot_dimension_numbers<[1], [0], [0], [1], [0, 0, 1, 1], [], []>} : vector<8x32xf32>, vector<32x128xf32>, vector<8x128xf32> -> vector<8x128xf32>
    %c0_56 = arith.constant 0 : index
    %c0_57 = arith.constant 0 : index
    %102 = vector.load %arg18[%c0_56, %c0_57] : memref<1x128xf32, #tpu.memory_space<vmem>>, vector<1x128xf32>
    %103 = vector.broadcast %102 : vector<1x128xf32> to vector<8x128xf32>
    %104 = arith.addf %101, %103 : vector<8x128xf32>
    %c0_58 = arith.constant 0 : index
    %c0_59 = arith.constant 0 : index
    %c0_60 = arith.constant 0 : index
    %105 = vector.load %arg19[%c0_58, %c0_59, %c0_60] : memref<1x8x128xf32, #tpu.memory_space<vmem>>, vector<1x8x128xf32>
    %106 = vector.shape_cast %105 : vector<1x8x128xf32> to vector<8x128xf32>
    %107 = vector.shape_cast %104 : vector<8x128xf32> to vector<1x8x128xf32>
    tpu.vector_store %arg19[%c0_58, %c0_59, %c0_60], %107 {strides = array<i32>} : memref<1x8x128xf32, #tpu.memory_space<vmem>>, vector<1x8x128xf32>,
    return
  }
  func.func @transform_0(%arg0: i32) -> (i32, i32, i32) {
    %c0_i32 = arith.constant 0 : i32
    %c0_i32_0 = arith.constant 0 : i32
    %c0_i32_1 = arith.constant 0 : i32
    return %arg0, %c0_i32, %c0_i32_0 : i32, i32, i32
  }
  func.func @transform_1(%arg0: i32) -> (i32, i32) {
    %c0_i32 = arith.constant 0 : i32
    %c0_i32_0 = arith.constant 0 : i32
    %c0_i32_1 = arith.constant 0 : i32
    return %c0_i32, %c0_i32_0 : i32, i32
  }
  func.func @transform_2(%arg0: i32) -> (i32, i32) {
    %c0_i32 = arith.constant 0 : i32
    %c0_i32_0 = arith.constant 0 : i32
    %c0_i32_1 = arith.constant 0 : i32
    return %c0_i32, %c0_i32_0 : i32, i32
  }
  func.func @transform_3(%arg0: i32) -> (i32, i32) {
    %c0_i32 = arith.constant 0 : i32
    %c0_i32_0 = arith.constant 0 : i32
    %c0_i32_1 = arith.constant 0 : i32
    return %c0_i32, %c0_i32_0 : i32, i32
  }
  func.func @transform_4(%arg0: i32) -> (i32, i32) {
    %c0_i32 = arith.constant 0 : i32
    %c0_i32_0 = arith.constant 0 : i32
    %c0_i32_1 = arith.constant 0 : i32
    return %c0_i32, %c0_i32_0 : i32, i32
  }
  func.func @transform_5(%arg0: i32) -> (i32, i32) {
    %c0_i32 = arith.constant 0 : i32
    %c0_i32_0 = arith.constant 0 : i32
    %c0_i32_1 = arith.constant 0 : i32
    return %c0_i32, %c0_i32_0 : i32, i32
  }
  func.func @transform_6(%arg0: i32) -> (i32, i32) {
    %c0_i32 = arith.constant 0 : i32
    %c0_i32_0 = arith.constant 0 : i32
    %c0_i32_1 = arith.constant 0 : i32
    return %c0_i32, %c0_i32_0 : i32, i32
  }
  func.func @transform_7(%arg0: i32) -> (i32, i32) {
    %c0_i32 = arith.constant 0 : i32
    %c0_i32_0 = arith.constant 0 : i32
    %c0_i32_1 = arith.constant 0 : i32
    return %c0_i32, %c0_i32_0 : i32, i32
  }
  func.func @transform_8(%arg0: i32) -> (i32, i32) {
    %c0_i32 = arith.constant 0 : i32
    %c0_i32_0 = arith.constant 0 : i32
    %c0_i32_1 = arith.constant 0 : i32
    return %c0_i32, %c0_i32_0 : i32, i32
  }
  func.func @transform_9(%arg0: i32) -> (i32, i32) {
    %c0_i32 = arith.constant 0 : i32
    %c0_i32_0 = arith.constant 0 : i32
    %c0_i32_1 = arith.constant 0 : i32
    return %c0_i32, %c0_i32_0 : i32, i32
  }
  func.func @transform_10(%arg0: i32) -> (i32, i32) {
    %c0_i32 = arith.constant 0 : i32
    %c0_i32_0 = arith.constant 0 : i32
    %c0_i32_1 = arith.constant 0 : i32
    return %c0_i32, %c0_i32_0 : i32, i32
  }
  func.func @transform_11(%arg0: i32) -> (i32, i32) {
    %c0_i32 = arith.constant 0 : i32
    %c0_i32_0 = arith.constant 0 : i32
    %c0_i32_1 = arith.constant 0 : i32
    return %c0_i32, %c0_i32_0 : i32, i32
  }
  func.func @transform_12(%arg0: i32) -> (i32, i32) {
    %c0_i32 = arith.constant 0 : i32
    %c0_i32_0 = arith.constant 0 : i32
    %c0_i32_1 = arith.constant 0 : i32
    return %c0_i32, %c0_i32_0 : i32, i32
  }
  func.func @transform_13(%arg0: i32) -> (i32, i32) {
    %c0_i32 = arith.constant 0 : i32
    %c0_i32_0 = arith.constant 0 : i32
    %c0_i32_1 = arith.constant 0 : i32
    return %c0_i32, %c0_i32_0 : i32, i32
  }
  func.func @transform_14(%arg0: i32) -> (i32, i32) {
    %c0_i32 = arith.constant 0 : i32
    %c0_i32_0 = arith.constant 0 : i32
    %c0_i32_1 = arith.constant 0 : i32
    return %c0_i32, %c0_i32_0 : i32, i32
  }
  func.func @transform_15(%arg0: i32) -> (i32, i32) {
    %c0_i32 = arith.constant 0 : i32
    %c0_i32_0 = arith.constant 0 : i32
    %c0_i32_1 = arith.constant 0 : i32
    return %c0_i32, %c0_i32_0 : i32, i32
  }
  func.func @transform_16(%arg0: i32) -> (i32, i32) {
    %c0_i32 = arith.constant 0 : i32
    %c0_i32_0 = arith.constant 0 : i32
    %c0_i32_1 = arith.constant 0 : i32
    return %c0_i32, %c0_i32_0 : i32, i32
  }
  func.func @transform_17(%arg0: i32) -> (i32, i32) {
    %c0_i32 = arith.constant 0 : i32
    %c0_i32_0 = arith.constant 0 : i32
    %c0_i32_1 = arith.constant 0 : i32
    return %c0_i32, %c0_i32_0 : i32, i32
  }
  func.func @transform_18(%arg0: i32) -> (i32, i32, i32) {
    %c0_i32 = arith.constant 0 : i32
    %c0_i32_0 = arith.constant 0 : i32
    %c0_i32_1 = arith.constant 0 : i32
    return %arg0, %c0_i32, %c0_i32_0 : i32, i32, i32
  }
}

module attributes {stable_mosaic.version = 11 : i64} {
  func.func @_lstm_lm_kernel(%arg0: memref<8x2x128xf32, #tpu.memory_space<vmem>>, %arg1: memref<32x128xf32, #tpu.memory_space<vmem>>, %arg2: memref<2x32xf32, #tpu.memory_space<vmem>>, %arg3: memref<2x32xf32, #tpu.memory_space<vmem>>, %arg4: memref<32x128xf32, #tpu.memory_space<vmem>>, %arg5: memref<1x128xf32, #tpu.memory_space<vmem>>, %arg6: memref<8x2x128xf32, #tpu.memory_space<vmem>>, %arg7: memref<2x32xf32, #tpu.memory_space<vmem>>, %arg8: memref<2x32xf32, #tpu.memory_space<vmem>>) attributes {dimension_semantics = [], scalar_prefetch = 0 : i64, scratch_operands = 0 : i64, tpu.core_type = #tpu.core_type<tc>} {
    %c0 = arith.constant 0 : index
    %c0_0 = arith.constant 0 : index
    %0 = vector.load %arg1[%c0, %c0_0] : memref<32x128xf32, #tpu.memory_space<vmem>>, vector<32x128xf32>
    %c0_1 = arith.constant 0 : index
    %c0_2 = arith.constant 0 : index
    %1 = vector.load %arg4[%c0_1, %c0_2] : memref<32x128xf32, #tpu.memory_space<vmem>>, vector<32x128xf32>
    %c0_3 = arith.constant 0 : index
    %c0_4 = arith.constant 0 : index
    %2 = vector.load %arg5[%c0_3, %c0_4] : memref<1x128xf32, #tpu.memory_space<vmem>>, vector<1x128xf32>
    %c0_5 = arith.constant 0 : index
    %c0_6 = arith.constant 0 : index
    %3 = vector.load %arg2[%c0_5, %c0_6] : memref<2x32xf32, #tpu.memory_space<vmem>>, vector<2x32xf32>
    %c0_7 = arith.constant 0 : index
    %c0_8 = arith.constant 0 : index
    %4 = vector.load %arg3[%c0_7, %c0_8] : memref<2x32xf32, #tpu.memory_space<vmem>>, vector<2x32xf32>
    %c0_i32 = arith.constant 0 : i32
    %c8_i32 = arith.constant 8 : i32
    %5 = arith.addi %c0_i32, %c8_i32 : i32
    %c1_i32 = arith.constant 1 : i32
    %6:2 = scf.for %arg9 = %c0_i32 to %5 step %c1_i32 iter_args(%arg10 = %3, %arg11 = %4) -> (vector<2x32xf32>, vector<2x32xf32>)  : i32 {
      %9 = arith.index_cast %arg9 : i32 to index
      %c0_14 = arith.constant 0 : index
      %c0_15 = arith.constant 0 : index
      %10 = vector.load %arg0[%9, %c0_14, %c0_15] : memref<8x2x128xf32, #tpu.memory_space<vmem>>, vector<1x2x128xf32>
      %11 = vector.shape_cast %10 : vector<1x2x128xf32> to vector<2x128xf32>
      %cst = arith.constant dense<0.000000e+00> : vector<2x128xf32>
      %12 = tpu.matmul %arg10, %0, %cst {dimension_numbers = #tpu.dot_dimension_numbers<[1], [0], [0], [1], [0, 0, 1, 1], [], []>} : vector<2x32xf32>, vector<32x128xf32>, vector<2x128xf32> -> vector<2x128xf32>
      %13 = arith.addf %11, %12 : vector<2x128xf32>
      %14 = vector.extract_strided_slice %13 {offsets = [0, 0], sizes = [2, 32], strides = [1, 1]} : vector<2x128xf32> to vector<2x32xf32>
      %15 = arith.negf %14 : vector<2x32xf32>
      %16 = math.exp %15 : vector<2x32xf32>
      %cst_16 = arith.constant 1.000000e+00 : f32
      %17 = vector.broadcast %cst_16 : f32 to vector<2x32xf32>
      %18 = arith.addf %17, %16 : vector<2x32xf32>
      %19 = arith.divf %17, %18 : vector<2x32xf32>
      %20 = vector.extract_strided_slice %13 {offsets = [0, 32], sizes = [2, 32], strides = [1, 1]} : vector<2x128xf32> to vector<2x32xf32>
      %21 = arith.negf %20 : vector<2x32xf32>
      %22 = math.exp %21 : vector<2x32xf32>
      %cst_17 = arith.constant 1.000000e+00 : f32
      %23 = vector.broadcast %cst_17 : f32 to vector<2x32xf32>
      %24 = arith.addf %23, %22 : vector<2x32xf32>
      %25 = arith.divf %23, %24 : vector<2x32xf32>
      %26 = vector.extract_strided_slice %13 {offsets = [0, 64], sizes = [2, 32], strides = [1, 1]} : vector<2x128xf32> to vector<2x32xf32>
      %27 = math.tanh %26 : vector<2x32xf32>
      %28 = vector.extract_strided_slice %13 {offsets = [0, 96], sizes = [2, 32], strides = [1, 1]} : vector<2x128xf32> to vector<2x32xf32>
      %29 = arith.negf %28 : vector<2x32xf32>
      %30 = math.exp %29 : vector<2x32xf32>
      %cst_18 = arith.constant 1.000000e+00 : f32
      %31 = vector.broadcast %cst_18 : f32 to vector<2x32xf32>
      %32 = arith.addf %31, %30 : vector<2x32xf32>
      %33 = arith.divf %31, %32 : vector<2x32xf32>
      %34 = arith.mulf %25, %arg11 : vector<2x32xf32>
      %35 = arith.mulf %19, %27 : vector<2x32xf32>
      %36 = arith.addf %34, %35 : vector<2x32xf32>
      %37 = math.tanh %36 : vector<2x32xf32>
      %38 = arith.mulf %33, %37 : vector<2x32xf32>
      %cst_19 = arith.constant dense<0.000000e+00> : vector<2x128xf32>
      %39 = tpu.matmul %38, %1, %cst_19 {dimension_numbers = #tpu.dot_dimension_numbers<[1], [0], [0], [1], [0, 0, 1, 1], [], []>} : vector<2x32xf32>, vector<32x128xf32>, vector<2x128xf32> -> vector<2x128xf32>
      %40 = vector.broadcast %2 : vector<1x128xf32> to vector<2x128xf32>
      %41 = arith.addf %39, %40 : vector<2x128xf32>
      %42 = arith.index_cast %arg9 : i32 to index
      %c0_20 = arith.constant 0 : index
      %c0_21 = arith.constant 0 : index
      %43 = vector.load %arg6[%42, %c0_20, %c0_21] : memref<8x2x128xf32, #tpu.memory_space<vmem>>, vector<1x2x128xf32>
      %44 = vector.shape_cast %43 : vector<1x2x128xf32> to vector<2x128xf32>
      %45 = vector.shape_cast %41 : vector<2x128xf32> to vector<1x2x128xf32>
      tpu.vector_store %arg6[%42, %c0_20, %c0_21], %45 {strides = array<i32>} : memref<8x2x128xf32, #tpu.memory_space<vmem>>, vector<1x2x128xf32>,
      scf.yield %38, %36 : vector<2x32xf32>, vector<2x32xf32>
    }
    %c8_i32_9 = arith.constant 8 : i32
    %c0_10 = arith.constant 0 : index
    %c0_11 = arith.constant 0 : index
    %7 = vector.load %arg7[%c0_10, %c0_11] : memref<2x32xf32, #tpu.memory_space<vmem>>, vector<2x32xf32>
    tpu.vector_store %arg7[%c0_10, %c0_11], %6#0 {strides = array<i32>} : memref<2x32xf32, #tpu.memory_space<vmem>>, vector<2x32xf32>,
    %c0_12 = arith.constant 0 : index
    %c0_13 = arith.constant 0 : index
    %8 = vector.load %arg8[%c0_12, %c0_13] : memref<2x32xf32, #tpu.memory_space<vmem>>, vector<2x32xf32>
    tpu.vector_store %arg8[%c0_12, %c0_13], %6#1 {strides = array<i32>} : memref<2x32xf32, #tpu.memory_space<vmem>>, vector<2x32xf32>,
    return
  }
}

</mosaic_0001>

<bundles_post_ra>
// kernel: lstm_decoder_with_attention_forward.3
= control target key start
LH: loop header
LB: loop body
LE: loop exit
PB: predicated region body
PF: predicated region fallthrough
CT: control target
= control target key end

     0   :  { %14 = vsyncpa [#allocation3], 0  ;;  %s586_s0 = inlined_call_operand.vmem [shape: f32[8,2,128], index: 0, kind: input, shape index: {}]   ;;  %s587_s1 = inlined_call_operand.vmem [shape: f32[32,128], index: 1, kind: input, shape index: {}]   ;;  %s588_s2 = inlined_call_operand.vmem [shape: f32[2,32], index: 2, kind: input, shape index: {}]   ;;  %s589_s3 = inlined_call_operand.vmem [shape: f32[2,32], index: 3, kind: input, shape index: {}]   ;;  %s590_s4 = inlined_call_operand.vmem [shape: f32[32,128], index: 4, kind: input, shape index: {}]   ;;  %s591_s5 = inlined_call_operand.vmem [shape: f32[1,128], index: 5, kind: input, shape index: {}]   ;;  %s592_s6 = inlined_call_operand.vmem [shape: f32[8,2,128], index: 6, kind: output, shape index: {0}]   ;;  %s593_s7 = inlined_call_operand.hbm [shape: f32[2,32], index: 7, kind: output, shape index: {1}]   ;;  %s594_s8 = inlined_call_operand.hbm [shape: f32[2,32], index: 8, kind: output, shape index: {2}]  }
   0x1   :  { %15 = vsyncpa [#allocation5], 0  ;;  %v490_v0 = vld [vmem:[%s587_s1] sm:$0xff]  ;;  %v495_v1 = vld [vmem:[%s587_s1 + $0x8] sm:$0xff]  ;;  %s542_s26 = smov 0  }
   0x2   :  { %v500_v2 = vld [vmem:[%s587_s1 + $0x10] sm:$0xff]  ;;  %v505_v3 = vld [vmem:[%s587_s1 + $0x18] sm:$0xff]  ;;  %v510_v4 = vld [vmem:[%s590_s4] sm:$0xff] }
   0x3   :  { %v515_v5 = vld [vmem:[%s590_s4 + $0x8] sm:$0xff]  ;;  %v520_v6 = vld [vmem:[%s590_s4 + $0x10] sm:$0xff]  ;;  %v525_v7 = vld [vmem:[%s590_s4 + $0x18] sm:$0xff] }
   0x4   :  { %v530_v8 = vld [vmem:[%s591_s5] ss:$0 sm:$0xff] }
   0x5   :  { %v37_v9 = vld [vmem:[%s588_s2] sm:$0x3]  }
   0x6   :  { %v38_v10 = vld [vmem:[%s589_s3] sm:$0x3]  }
   0x7 LB: > { %v435_v11 = vmov 0.0   ;;  %vm436_vm0 = vmmov 0   ;;  %vm50_vm1 = vcmask 261120   ;;  %s291_s2 = sshll.u32 %s433_s26, 1  ;;  %s437_s27 = smov 64   ;;  %s433_s26 = sphi %s542_s26, %s44_s26   ;;  %v429_v9 = vphi %v37_v9, %v596_v9   ;;  %v425_v10 = vphi %v38_v10, %v595_v10  }
   0x8   : > { %306 = vmatprep.subr.mxu0 %v435_v11  ;;  %314 = vmatprep.mubr.msk.f32.mxu0 %vm436_vm0, %v435_v11  ;;  %s48_s5 = scalar_lea.vmem %s586_s0, %s291_s2  ;;  %s438_s28 = smov 32  }
   0x9   : > { %307 = vmatpush3.msra.mxu0 %v505_v3  ;;  %317 = vmatprep.subr.mxu1 %v435_v11  ;;  %v49_v12 = vld [vmem:[%s48_s5] sm:$0x3]  ;;  %s439_s29 = smov 96   ;;  %s234_s10 = scalar_lea.vmem %s592_s6, %s291_s2 }
   0xa   : > { %308 = vmatprep.subr.mxu0 %v435_v11  ;;  %318 = vmatpush3.msra.mxu1 %v525_v7  ;;  %s44_s26 = sadd.s32 1, %s433_s26  }
   0xb   : > { %309 = vmatpush3.msra.mxu0 %v500_v2  ;;  %319 = vmatprep.subr.mxu1 %v435_v11  ;;  %p41_p0 = scmp.ge.s32.totalorder %s44_s26, 8  }
   0xc   : > { %310 = vmatprep.subr.mxu0 %v435_v11  ;;  %320 = vmatpush3.msra.mxu1 %v520_v6  ;;  %vm241_vm2 = vcmask (%p41_p0), 254976   ;;  %s440_s11 = smov (%p41_p0), [#allocation2]   ;;  %s441_s13 = smov (%p41_p0), [#allocation4]  }
   0xd   : > { %311 = vmatpush3.msra.mxu0 %v495_v1  ;;  %321 = vmatprep.subr.mxu1 %v435_v11  ;;  %s252_s12 = sshll.u32 (%p41_p0), %s440_s11, 4  ;;  %s262_s14 = sshll.u32 (%p41_p0), %s441_s13, 4  ;;  %s253_s12 = int_to_ptr.vmem [resolvable:$true] %s252_s12  ;;  %s263_s14 = int_to_ptr.vmem [resolvable:$true] %s262_s14 }
   0xe   : > { %312 = vmatprep.subr.mxu0 %v435_v11  ;;  %322 = vmatpush3.msra.mxu1 %v515_v5  ;;  %s367_s15 = scalar_lea.vmem (%p41_p0), %s253_s12, 32  ;;  %p372_p2 = scmp.lt.s32.totalorder (%p41_p0), %s253_s12, %s253_s12 }
   0xf   : > { %313 = vmatpush3.msra.mxu0 %v490_v0  ;;  %323 = vmatprep.subr.mxu1 %v435_v11  ;;  %p368_p1 = scmp.ne.s32.totalorder (%p41_p0), %s253_s12, %s367_s15  ;;  %p373_p3 = scmp.lt.s32.totalorder (%p41_p0), %s367_s15, %s367_s15 }
  0x10   : > { %315 = vmatmul.mubr.msk.f32.vlgmr.msra.gmra.mxu0 %vm50_vm1, %v429_v9  ;;  %324 = vmatpush3.msra.mxu1 %v510_v4 }
  0x11   : > { %325 = vmatprep.mubr.msk.f32.mxu1 %vm436_vm0, %v435_v11  ;;  %p374_p4 = por (%p41_p0), %p373_p3, %p372_p2 }
  0x13   :  { %p375_p5 = pnand (%p41_p0), %p374_p4, %p368_p1 }
  0xd0   : > { %v120_v13 = vpop.f32.mrf.mxu0 }
  0xd1   : > { %v124_v14 = vadd.f32 %v120_v13, %v49_v12 }
  0xd2   : > { %v316_v15 = vpop.f32.mrf.mxu0 }
  0xd3   : > { %359 = vtanh.f32 %v124_v14  ;;  %v293_v17 = vmul.f32 -1.442695, %v124_v14 }
  0xd5   : > { %361 = vpow2.f32 %v293_v17 }
  0xe0   : > { %v360_v16 = vpop.eup %359 }
  0xe1   : > { %138 = vrot.lane.b32.xlu0 %v360_v16, %s437_s27 }
  0xe2   : > { %v362_v18 = vpop.eup %361 }
  0xe3   : > { %v128_v19 = vadd.f32 1.0, %v362_v18 }
  0xe5   : > { %133 = vrot.lane.b32.xlu0 %v425_v10, %s438_s28  ;;  %363 = vrcp.f32 %v128_v19 }
  0xf2   : > { %v364_v20 = vpop.eup %363 }
 0x153   : > { %v139_v21 = vpop.permute.xlu0 %138 }
 0x154   : > { %v141_v22 = vmul.f32 %v364_v20, %v139_v21 }
 0x156   : > { %143 = vrot.lane.b32.xlu1 %v141_v22, %s438_s28 }
 0x157   : > { %v134_v23 = vpop.permute.xlu0 %133 }
 0x158   : > { %v136_v24 = vmul.f32 %v364_v20, %v134_v23 }
 0x1c8   : > { %v144_v25 = vpop.permute.xlu1 %143 }
 0x1c9   : > { %v146_v26 = vadd.f32 %v144_v25, %v136_v24 }
 0x1cb   : > { %365 = vtanh.f32 %v146_v26 }
 0x1d8   : > { %v366_v27 = vpop.eup %365 }
 0x1d9   : > { %149 = vrot.lane.b32.xlu1 %v366_v27, %s437_s27 }
 0x1dd   : > { %238 = vrot.lane.b32.xlu1 %v146_v26, %s439_s29 }
 0x24b   : > { %v150_v28 = vpop.permute.xlu1 %149 }
 0x24c   : > { %v152_v29 = vmul.f32 %v364_v20, %v150_v28 }
 0x24e   : > { %160 = vrot.lane.b32.xlu0 %v152_v29, %s438_s28 }
 0x24f   : > { %v239_v30 = vpop.permute.xlu1 %238  }
 0x250   : > { %v595_v10 = vmov %v239_v30  ;;  %243 = vst.msk [vmem:[#allocation4] sm:$0x3] (%p41_p0), %vm241_vm2, %v239_v30 }
 0x2c0   : > { %v161_v31 = vpop.permute.xlu0 %160  }
 0x2c1   : > { %326 = vmatmul.mubr.msk.f32.vlgmr.msra.gmra.mxu1 %vm50_vm1, %v161_v31  ;;  %v596_v9 = vmov %v161_v31  ;;  %242 = vst.msk [vmem:[#allocation2] sm:$0x3] (%p41_p0), %vm241_vm2, %v161_v31 }
 0x380   :  { %43 = sbr.rel (!%p41_p0) target bundleno = 7 (0x7), region = 69 }
 0x381   : > { %v230_v32 = vpop.f32.mrf.mxu1 }
 0x382   : > { %v231_v33 = vadd.f32 %v530_v8, %v230_v32 }
 0x383   : > { %v327_v34 = vpop.f32.mrf.mxu1 }
 0x384   : > { %235 = vst [vmem:[%s234_s10] sm:$0x3] %v231_v33 }
 0x385   :  { %378 = shalt.err (!%p375_p5)
}
 0x386   :  { %255 = dma.vmem_to_hbm [thread:$0]  %s253_s12, 32, %s593_s7, [#allocation3]  }
 0x387   :  { %s387_s0 = scalar_lea.vmem %s263_s14, 32  ;;  %p392_p7 = scmp.lt.s32.totalorder %s263_s14, %s263_s14 }
 0x388   :  { %p388_p6 = scmp.ne.s32.totalorder %s263_s14, %s387_s0  ;;  %p393_p8 = scmp.lt.s32.totalorder %s387_s0, %s387_s0 }
 0x38a   :  { %p394_p9 = por %p393_p8, %p392_p7 }
 0x38c   :  { %p395_p10 = pnand %p394_p9, %p388_p6 }
 0x38e   :  { %398 = shalt.err (!%p395_p10)
}
 0x38f   :  { %265 = dma.vmem_to_hbm [thread:$0]  %s263_s14, 32, %s594_s8, [#allocation5]  }
 0x390   :  { %419 = dma.done.wait [#allocation3], 32  }
 0x391   :  { %420 = vsyncadd [#allocation3], 4294967264 }
 0x392   :  { %421 = dma.done.wait [#allocation5], 32  }
 0x393   :  { %422 = vsyncadd [#allocation5], 4294967264 }
 0x394   :  { %274 = vsyncpa [#allocation3], 1 }
 0x395   :  { %275 = vsyncpa [#allocation5], 1 }

// kernel: lstm_decoder_with_attention_forward.2
= control target key start
LH: loop header
LB: loop body
LE: loop exit
PB: predicated region body
PF: predicated region fallthrough
CT: control target
= control target key end

     0   :  { %s2032_s0 = inlined_call_operand.vmem [shape: f32[2,8,16], index: 0, kind: input, shape index: {}]   ;;  %s2033_s1 = inlined_call_operand.hbm [shape: f32[16,32], index: 1, kind: input, shape index: {}]   ;;  %s2034_s2 = inlined_call_operand.vmem [shape: f32[1,32], index: 2, kind: input, shape index: {}]   ;;  %s2035_s3 = inlined_call_operand.vmem [shape: f32[32,96], index: 3, kind: input, shape index: {}]   ;;  %s2036_s4 = inlined_call_operand.vmem [shape: f32[1,96], index: 4, kind: input, shape index: {}]   ;;  %s2037_s5 = inlined_call_operand.vmem [shape: f32[32,32], index: 5, kind: input, shape index: {}]   ;;  %s2038_s6 = inlined_call_operand.vmem [shape: f32[1,32], index: 6, kind: input, shape index: {}]   ;;  %s2039_s7 = inlined_call_operand.vmem [shape: f32[1,32], index: 7, kind: input, shape index: {}]   ;;  %s2040_s8 = inlined_call_operand.vmem [shape: f32[1,32], index: 8, kind: input, shape index: {}]   ;;  %s2041_s9 = inlined_call_operand.vmem [shape: f32[32,32], index: 9, kind: input, shape index: {}]   ;;  %s2042_s10 = inlined_call_operand.vmem [shape: f32[1,32], index: 10, kind: input, shape index: {}]   ;;  %s2043_s11 = inlined_call_operand.hbm [shape: f32[32,32], index: 11, kind: input, shape index: {}]   ;;  %s2044_s12 = inlined_call_operand.vmem [shape: f32[1,32], index: 12, kind: input, shape index: {}]   ;;  %s2045_s13 = inlined_call_operand.vmem [shape: f32[1,32], index: 13, kind: input, shape index: {}]   ;;  %s2046_s14 = inlined_call_operand.vmem [shape: f32[1,32], index: 14, kind: input, shape index: {}]   ;;  %s2047_s15 = inlined_call_operand.vmem [shape: f32[8,32], index: 15, kind: input, shape index: {}]   ;;  %s2048_s16 = inlined_call_operand.hbm [shape: f32[32,128], index: 16, kind: input, shape index: {}]   ;;  %s2049_s17 = inlined_call_operand.vmem [shape: f32[1,128], index: 17, kind: input, shape index: {}]   ;;  %s2050_s18 = inlined_call_operand.vmem [shape: f32[2,8,128], index: 18, kind: output, shape index: {}]  }
   0x1   :  { %2051 = sst [smem:[#allocation9_spill]] %s2032_s0 }
   0x2   :  { %2052 = sst [smem:[#allocation10_spill]] %s2033_s1 }
   0x3   :  { %2053 = sst [smem:[#allocation11_spill]] %s2034_s2 }
   0x4   :  { %23 = vsyncpa [#allocation3], 0 }
   0x5   :  { %24 = vsyncpa [#allocation5], 0  ;;  %s1825_s27 = smov 0  }
   0x6 LB: > { %s1831_s28 = sadd.s32 4294967295, %s1719_s27   ;;  %p1438_p0 = scmp.ge.s32.totalorder %s1719_s27, 1  ;;  %s1719_s27 = sphi %s1825_s27, %s30_s27  }
   0x7   : > { %p444_p1 = scmp.lt.s32.totalorder %s1719_s27, 3  ;;  %p1596_p2 = scmp.eq.s32.totalorder %s1831_s28, 0 }
   0x8   : > { %s1721_s30 = smov [#allocation4]   ;;  %s1722_s19 = smov [#allocation2]  }
   0x9   : > { %p1836_p3 = pnand %p1438_p0, %p444_p1  ;;  %s496_s0 = sshll.u32 %s1721_s30, 4  ;;  %s497_s0 = int_to_ptr.vmem [resolvable:$true] %s496_s0 }
   0xa   : > { %s456_s1 = sshll.u32 %s1722_s19, 4  ;;  %s1723_s21 = smov [#allocation6]   ;;  %s457_s1 = int_to_ptr.vmem [resolvable:$true] %s456_s1 }
   0xb   : > { %p1586_p4 = pneg %p1836_p3  ;;  %s521_s22 = sshll.u32 %s1723_s21, 4  ;;  %s1848_s22 = int_to_ptr.vmem [resolvable:$true] %s521_s22 }
   0xc   : > { %s1638_s2 = scalar_lea.vmem %s497_s0, 512  ;;  %p1646_p10 = scmp.lt.s32.totalorder %s497_s0, %s497_s0 }
   0xd   : > { %p1844_p5 = pnand %p1596_p2, %p1586_p4  ;;  %p1639_p7 = scmp.ne.s32.totalorder %s497_s0, %s1638_s2 }
   0xe   : > { %p1647_p11 = scmp.lt.s32.totalorder %s1638_s2, %s1638_s2 }
   0xf   : > { %p1629_p6 = pneg %p1844_p5 }
  0x10   : > { %p1648_p12 = por %p1647_p11, %p1646_p10 }
  0x11   : > { %p1641_p8 = pnand %p1639_p7, %p1629_p6 }
  0x13   : > { %p1642_p9 = pneg %p1641_p8 }
  0x15   : > { %p1649_p13 = pnand %p1648_p12, %p1642_p9 }
  0x17   : > { %1652 = shalt.err (!%p1649_p13)
}
  0x18   : > { %s1724_s23 = smov 128   ;;  %s1725_s24 = smov 8  }
  0x19   : > { %1592 = dma.hbm_to_vmem [thread:$0]  (!%p1844_p5), %s2043_s11, 512, %s497_s0, [#allocation5], %s1724_s23, %s1724_s23, %s1725_s24  }
  0x1a   : > { %s1664_s30 = scalar_lea.vmem %s457_s1, 256  ;;  %p1672_p7 = scmp.lt.s32.totalorder %s457_s1, %s457_s1 }
  0x1b   : > { %p1665_p0 = scmp.ne.s32.totalorder %s457_s1, %s1664_s30  ;;  %p1673_p8 = scmp.lt.s32.totalorder %s1664_s30, %s1664_s30 }
  0x1d   : > { %p1667_p1 = pnand %p1665_p0, %p1629_p6  ;;  %p1674_p10 = por %p1673_p8, %p1672_p7 }
  0x1f   : > { %p1668_p4 = pneg %p1667_p1 }
  0x21   : > { %p1675_p9 = pnand %p1674_p10, %p1668_p4 }
  0x23   : > { %1678 = shalt.err (!%p1675_p9)
}
  0x24   : > { %s2056_s2 = sld [smem:[#allocation10_spill]]  ;;  %s1690_s0 = scalar_lea.vmem %s1848_s22, 512 }
  0x25   : > { %p1691_p11 = scmp.ne.s32.totalorder %s1848_s22, %s1690_s0  ;;  %p1698_p0 = scmp.lt.s32.totalorder %s1848_s22, %s1848_s22 }
  0x26   : > { %p1699_p1 = scmp.lt.s32.totalorder %s1690_s0, %s1690_s0 }
  0x27   : > { %p1693_p12 = pnand %p1691_p11, %p1629_p6 }
  0x28   : > { %p1700_p4 = por %p1699_p1, %p1698_p0 }
  0x29   : > { %p1694_p13 = pneg %p1693_p12 }
  0x2a   : > { %1589 = dma.hbm_to_vmem [thread:$0]  (!%p1844_p5), %s2056_s2, 256, %s457_s1, [#allocation3], %s1724_s23, %s1724_s23, %s1725_s24  }
  0x2b   : > { %p1701_p7 = pnand %p1700_p4, %p1694_p13 }
  0x2d   : > { %1704 = shalt.err (!%p1701_p7)
}
  0x2e   : > { %1595 = dma.hbm_to_vmem [thread:$0]  (!%p1844_p5), %s2048_s16, 512, %s1848_s22, [#allocation5], %s1724_s23, %s1724_s23, %s1725_s24  }
  0x2f   : > { %547 = sbr.rel (%p1836_p3) target bundleno = 2678 (0xa76), region = 92 }
  0x34   : > { %1710 = dma.done.wait (%p1596_p2), [#allocation3], 256  }
  0x35   : > { %1712 = vsyncadd (%p1596_p2), [#allocation3], 4294967040 }
  0x36   : > { %1714 = dma.done.wait (%p1596_p2), [#allocation5], 1024  }
  0x37   : > { %1716 = vsyncadd (%p1596_p2), [#allocation5], 4294966272  ;;  %p607_p6 = scmp.lt.s32.totalorder %s1831_s28, 1  ;;  %v1726_v0 = vmov 0.0   ;;  %vm1727_vm0 = vmmov 0   ;;  %s2057_s22 = sld [smem:[#allocation9_spill]] }
  0x38   : > { %1502 = vmatprep.subr.mxu0 %v1726_v0  ;;  %1506 = vmatprep.mubr.msk.f32.mxu0 %vm1727_vm0, %v1726_v0  ;;  %v618_v1 = vld [vmem:[#allocation2 + $0x8] sm:$0xff]  ;;  %v617_v2 = vld [vmem:[#allocation2] sm:$0xff]  ;;  %vm626_vm1 = vcmask 130048   ;;  %v703_v5 = vld [vmem:[%s2035_s3 + $0x18] sm:$0xff]  ;;  %vm711_vm2 = vcmask 261120   ;;  %s1728_s30 = smov 96  }
  0x39   : > { %s2060_s28 = smov (!%p607_p6, %s1831_s28), 1  ;;  %1509 = vmatprep.subr.mxu1 %v1726_v0  ;;  %1517 = vmatprep.mubr.msk.f32.mxu1 %vm1727_vm0, %v1726_v0  ;;  %v702_v6 = vld [vmem:[%s2035_s3 + $0x10] sm:$0xff]  ;;  %v701_v7 = vld [vmem:[%s2035_s3 + $0x8] sm:$0xff]  ;;  %v700_v8 = vld [vmem:[%s2035_s3] sm:$0xff]  ;;  %vm863_vm3 = vcmask 64512   ;;  %s1729_s19 = smov 64  }
  0x3a   : > { %s1447_s29 = sshll.u32 %s2060_s28, 3  ;;  %1503 = vmatpush3.msra.mxu0 %v618_v1  ;;  %1510 = vmatpush3.msra.mxu1 %v703_v5  ;;  %v1451_v13 = vld [vmem:[%s2036_s4] ss:$0 sm:$0xff]  ;;  %v954_v27 = vld [vmem:[%s2037_s5 + $0x18] sm:$0xff]  ;;  %v953_v28 = vld [vmem:[%s2037_s5 + $0x10] sm:$0xff] }
  0x3b   : > { %1504 = vmatprep.subr.mxu0 %v1726_v0  ;;  %1511 = vmatprep.subr.mxu1 %v1726_v0  ;;  %v952_v29 = vld [vmem:[%s2037_s5 + $0x8] sm:$0xff]  ;;  %v951_v34 = vld [vmem:[%s2037_s5] sm:$0xff]  ;;  %v1069_v48 = vld [vmem:[%s2041_s9 + $0x18] sm:$0xff]  ;;  %s614_s21 = scalar_lea.vmem %s2050_s18, %s1447_s29 }
  0x3c   : > { %1505 = vmatpush3.msra.mxu0 %v617_v2  ;;  %1512 = vmatpush3.msra.mxu1 %v702_v6  ;;  %v1456_v37 = vld [vmem:[%s2038_s6] ss:$0 sm:$0xff]  ;;  %v1068_v49 = vld [vmem:[%s2041_s9 + $0x10] sm:$0xff]  ;;  %v1067_v50 = vld [vmem:[%s2041_s9 + $0x8] sm:$0xff] }
  0x3d   : > { %s610_s23 = scalar_lea.vmem %s2057_s22, %s1447_s29  ;;  %1513 = vmatprep.subr.mxu1 %v1726_v0  ;;  %1520 = vmatprep.subr.mxu0 %v1726_v0  ;;  %s2058_s22 = sld [smem:[#allocation11_spill]]  ;;  %v1066_v51 = vld [vmem:[%s2041_s9] sm:$0xff]  ;;  %v1154_v52 = vld [vmem:[#allocation4 + $0x18] sm:$0xff]  ;;  %v1152_v63 = vld [vmem:[#allocation4 + $0x8] sm:$0xff] }
  0x3e   : > { %v615_v3 = vld [vmem:[%s610_s23] sm:$0xff]  ;;  %1514 = vmatpush3.msra.mxu1 %v701_v7  ;;  %v1151_v1 = vld [vmem:[#allocation4] sm:$0xff] }
  0x3f   : > { %v616_v4 = vmax.f32 %v615_v3, 0.0  ;;  %1515 = vmatprep.subr.mxu1 %v1726_v0  ;;  %v1458_v57 = vld [vmem:[%s2039_s7] ss:$0 sm:$0xff] }
  0x40   : > { %1516 = vmatpush3.msra.mxu1 %v700_v8  ;;  %v1459_v59 = vld [vmem:[%s2040_s8] ss:$0 sm:$0xff] }
  0x41   : > { %1507 = vmatmul.mubr.msk.f32.vlgmr.msra.gmra.mxu0 %vm626_vm1, %v616_v4  ;;  %1530 = vmatprep.subr.mxu1 %v1726_v0  ;;  %v1153_v62 = vld [vmem:[#allocation4 + $0x10] sm:$0xff] }
  0x42   : > { %1522 = vmatprep.mubr.msk.f32.mxu0 %vm1727_vm0, %v1726_v0  ;;  %v1460_v2 = vld [vmem:[%s2042_s10] ss:$0 sm:$0xff] }
  0x43   : > { %v1449_v9 = vld [vmem:[%s2058_s22] ss:$0 sm:$0xff] }
  0x44   : > { %v1462_v7 = vld [vmem:[%s2044_s12] ss:$0 sm:$0xff] }
 0x101   : > { %v696_v10 = vpop.f32.mrf.mxu0 }
 0x102   : > { %v697_v11 = vadd.f32 %v1449_v9, %v696_v10 }
 0x103   : > { %v1508_v12 = vpop.f32.mrf.mxu0 }
 0x104   : > { %1518 = vmatmul.mubr.msk.f32.vlgmr.msra.gmra.mxu1 %vm711_vm2, %v697_v11 }
 0x105   : > { %1538 = vmatprep.mubr.msk.f32.mxu1 %vm1727_vm0, %v1726_v0  ;;  %1531 = vmatpush3.msra.mxu1 %v954_v27 }
 0x106   : > { %1532 = vmatprep.subr.mxu1 %v1726_v0 }
 0x107   : > { %1533 = vmatpush3.msra.mxu1 %v953_v28  ;;  %v1465_v28 = vld [vmem:[%s2046_s14] ss:$0 sm:$0xff] }
 0x108   : > { %1534 = vmatprep.subr.mxu1 %v1726_v0 }
 0x109   : > { %1535 = vmatpush3.msra.mxu1 %v952_v29 }
 0x10a   : > { %1536 = vmatprep.subr.mxu1 %v1726_v0 }
 0x10b   : > { %1537 = vmatpush3.msra.mxu1 %v951_v34 }
 0x10c   : > { %1552 = vmatprep.subr.mxu1 %v1726_v0 }
 0x1c4   : > { %v781_v14 = vpop.f32.mrf.mxu1 }
 0x1c5   : > { %v782_v15 = vadd.f32 %v1451_v13, %v781_v14 }
 0x1c6   : > { %v1519_v16 = vpop.f32.mrf.mxu1 }
 0x1c7   : > { %786 = vrot.lane.b32.xlu0 %v782_v15, %s1728_s30 }
 0x239   : > { %v787_v17 = vpop.permute.xlu0 %786 }
 0x23a   : > { %1521 = vmatpush3.xpose.msk.msra.mxu0 %vm711_vm2, %v787_v17 }
 0x23b   : > { %1525 = vmatprep.subr.mxu0 %v1726_v0 }
 0x23d   : > { %1523 = vmatmul.mubr.msk.f32.vlgmr.msra.gmra.mxu0 %vm711_vm2, %v782_v15 }
 0x23e   : > { %1527 = vmatprep.mubr.msk.f32.mxu0 %vm1727_vm0, %v1726_v0 }
 0x2fd   : > { %v858_v18 = vpop.f32.mrf.mxu0 }
 0x2fe   : > { %v862_v19 = vmul.f32 0.17677669, %v858_v18  ;;  %v1270_v18 = vld [vmem:[#allocation6 + $0x18] sm:$0xff] }
 0x2ff   : > { %v1524_v20 = vpop.f32.mrf.mxu0 }
 0x300   : > { %v864_v21 = vsel %vm863_vm3, %v862_v19, -inf  ;;  %v1268_v20 = vld [vmem:[#allocation6 + $0x8] sm:$0xff] }
 0x301   : > { %865 = vmax.xlane.f32.xlu0 %v864_v21  ;;  %v1267_v21 = vld [vmem:[#allocation6] sm:$0xff] }
 0x38a   : > { %v866_v22 = vpop.xlane.xlu0 %865 }
 0x38b   : > { %v867_v23 = vsub.f32 %v862_v19, %v866_v22  ;;  %v1269_v19 = vld [vmem:[#allocation6 + $0x10] sm:$0xff] }
 0x38d   : > { %v868_v24 = vmul.f32 1.442695, %v867_v23 }
 0x38f   : > { %1619 = vpow2.f32 %v868_v24 }
 0x39c   : > { %v1620_v25 = vpop.eup %1619 }
 0x39d   : > { %v870_v26 = vsel %vm863_vm3, %v1620_v25, 0.0 }
 0x39e   : > { %871 = vadd.xlane.f32.xlu1 %v870_v26  ;;  %v1464_v26 = vld [vmem:[%s2045_s13] ss:$0 sm:$0xff] }
 0x3af   : > { %875 = vrot.lane.b32.xlu1 %v782_v15, %s1729_s19 }
 0x427   : > { %v872_v30 = vpop.xlane.xlu1 %871 }
 0x428   : > { %1621 = vrcp.f32 %v872_v30 }
 0x42b   : > { %v876_v31 = vpop.permute.xlu1 %875 }
 0x42c   : > { %1526 = vmatpush3.msra.mxu0 %v876_v31 }
 0x42d   : > { %1541 = vmatprep.subr.mxu0 %v1726_v0 }
 0x435   : > { %v1622_v32 = vpop.eup %1621 }
 0x436   : > { %v874_v33 = vmul.f32 %v1622_v32, %v1620_v25  ;;  %v1466_v32 = vld [vmem:[%s2049_s17] ss:$0 sm:$0xff] }
 0x438   : > { %1528 = vmatmul.mubr.msk.f32.vlgmr.msra.gmra.mxu0 %vm863_vm3, %v874_v33 }
 0x439   : > { %1549 = vmatprep.mubr.msk.f32.mxu0 %vm1727_vm0, %v1726_v0  ;;  %1542 = vmatpush3.msra.mxu0 %v1069_v48 }
 0x43a   : > { %1543 = vmatprep.subr.mxu0 %v1726_v0 }
 0x43b   : > { %1544 = vmatpush3.msra.mxu0 %v1068_v49 }
 0x43c   : > { %1545 = vmatprep.subr.mxu0 %v1726_v0 }
 0x43d   : > { %1546 = vmatpush3.msra.mxu0 %v1067_v50 }
 0x43e   : > { %1547 = vmatprep.subr.mxu0 %v1726_v0 }
 0x43f   : > { %1548 = vmatpush3.msra.mxu0 %v1066_v51 }
 0x440   : > { %1563 = vmatprep.subr.mxu0 %v1726_v0 }
 0x4f8   : > { %v947_v35 = vpop.f32.mrf.mxu0 }
 0x4f9   : > { %1539 = vmatmul.mubr.msk.f32.vlgmr.msra.gmra.mxu1 %vm711_vm2, %v947_v35 }
 0x4fa   : > { %v1529_v36 = vpop.f32.mrf.mxu0  ;;  %1560 = vmatprep.mubr.msk.f32.mxu1 %vm1727_vm0, %v1726_v0  ;;  %1553 = vmatpush3.msra.mxu1 %v1154_v52 }
 0x4fb   : > { %1554 = vmatprep.subr.mxu1 %v1726_v0 }
 0x4fc   : > { %1555 = vmatpush3.msra.mxu1 %v1153_v62 }
 0x4fd   : > { %1556 = vmatprep.subr.mxu1 %v1726_v0 }
 0x4fe   : > { %1557 = vmatpush3.msra.mxu1 %v1152_v63 }
 0x4ff   : > { %1558 = vmatprep.subr.mxu1 %v1726_v0 }
 0x500   : > { %1559 = vmatpush3.msra.mxu1 %v1151_v1 }
 0x5b9   : > { %v1031_v38 = vpop.f32.mrf.mxu1 }
 0x5ba   : > { %v1032_v39 = vadd.f32 %v1456_v37, %v1031_v38 }
 0x5bb   : > { %v1540_v40 = vpop.f32.mrf.mxu1 }
 0x5bc   : > { %v1035_v41 = vadd.f32 %v1032_v39, %v697_v11 }
 0x5be   : > { %v1036_v42 = vsel %vm711_vm2, %v1035_v41, 0.0 }
 0x5bf   : > { %1037 = vadd.xlane.f32.xlu1 %v1036_v42 }
 0x648   : > { %v1038_v43 = vpop.xlane.xlu1 %1037 }
 0x649   : > { %v1040_v44 = vmul.f32 0.03125, %v1038_v43 }
 0x64b   : > { %v1041_v45 = vsub.f32 %v1035_v41, %v1040_v44 }
 0x64d   : > { %v1042_v46 = vmul.f32 %v1041_v45, %v1041_v45 }
 0x64f   : > { %v1043_v47 = vsel %vm711_vm2, %v1042_v46, 0.0 }
 0x650   : > { %1044 = vadd.xlane.f32.xlu0 %v1043_v47 }
 0x6d9   : > { %v1045_v53 = vpop.xlane.xlu0 %1044 }
 0x6da   : > { %v1046_v54 = vmul.f32 0.03125, %v1045_v53 }
 0x6dc   : > { %v1047_v55 = vadd.f32 1e-05, %v1046_v54 }
 0x6de   : > { %1623 = vrsqrt.f32 %v1047_v55 }
 0x6eb   : > { %v1624_v56 = vpop.eup %1623 }
 0x6ec   : > { %v1049_v58 = vmul.f32 %v1624_v56, %v1041_v45 }
 0x6ee   : > { %v1057_v60 = vmul.f32 %v1458_v57, %v1049_v58 }
 0x6f0   : > { %v1065_v61 = vadd.f32 %v1459_v59, %v1057_v60 }
 0x6f2   : > { %1550 = vmatmul.mubr.msk.f32.vlgmr.msra.gmra.mxu0 %vm711_vm2, %v1065_v61 }
 0x6f3   : > { %1571 = vmatprep.mubr.msk.f32.mxu0 %vm1727_vm0, %v1726_v0  ;;  %1564 = vmatpush3.msra.mxu0 %v1270_v18 }
 0x6f4   : > { %1565 = vmatprep.subr.mxu0 %v1726_v0 }
 0x6f5   : > { %1566 = vmatpush3.msra.mxu0 %v1269_v19 }
 0x6f6   : > { %1567 = vmatprep.subr.mxu0 %v1726_v0 }
 0x6f7   : > { %1568 = vmatpush3.msra.mxu0 %v1268_v20 }
 0x6f8   : > { %1569 = vmatprep.subr.mxu0 %v1726_v0  ;;  %v1265_v0 = vld [vmem:[%s2047_s15] sm:$0xff] }
 0x6f9   : > { %1570 = vmatpush3.msra.mxu0 %v1267_v21 }
 0x7b2   : > { %v1146_v3 = vpop.f32.mrf.mxu0 }
 0x7b3   : > { %v1147_v4 = vadd.f32 %v1460_v2, %v1146_v3 }
 0x7b4   : > { %v1551_v5 = vpop.f32.mrf.mxu0 }
 0x7b5   : > { %v1150_v6 = vmax.f32 %v1147_v4, 0.0 }
 0x7b7   : > { %1561 = vmatmul.mubr.msk.f32.vlgmr.msra.gmra.mxu1 %vm711_vm2, %v1150_v6 }
 0x877   : > { %v1231_v8 = vpop.f32.mrf.mxu1 }
 0x878   : > { %v1232_v9 = vadd.f32 %v1462_v7, %v1231_v8 }
 0x879   : > { %v1562_v10 = vpop.f32.mrf.mxu1 }
 0x87a   : > { %v1235_v11 = vadd.f32 %v1232_v9, %v1065_v61 }
 0x87c   : > { %v1236_v12 = vsel %vm711_vm2, %v1235_v11, 0.0 }
 0x87d   : > { %1237 = vadd.xlane.f32.xlu0 %v1236_v12 }
 0x906   : > { %v1238_v13 = vpop.xlane.xlu0 %1237 }
 0x907   : > { %v1239_v14 = vmul.f32 0.03125, %v1238_v13 }
 0x909   : > { %v1240_v15 = vsub.f32 %v1235_v11, %v1239_v14 }
 0x90b   : > { %v1241_v16 = vmul.f32 %v1240_v15, %v1240_v15 }
 0x90d   : > { %v1242_v17 = vsel %vm711_vm2, %v1241_v16, 0.0 }
 0x90e   : > { %1243 = vadd.xlane.f32.xlu0 %v1242_v17 }
 0x997   : > { %v1244_v22 = vpop.xlane.xlu0 %1243 }
 0x998   : > { %v1245_v23 = vmul.f32 0.03125, %v1244_v22 }
 0x99a   : > { %v1246_v24 = vadd.f32 1e-05, %v1245_v23 }
 0x99c   : > { %1625 = vrsqrt.f32 %v1246_v24 }
 0x9a9   : > { %v1626_v25 = vpop.eup %1625 }
 0x9aa   : > { %v1248_v27 = vmul.f32 %v1626_v25, %v1240_v15 }
 0x9ac   : > { %v1256_v29 = vmul.f32 %v1464_v26, %v1248_v27 }
 0x9ae   : > { %v1264_v30 = vadd.f32 %v1465_v28, %v1256_v29 }
 0x9b0   : > { %v1266_v31 = vadd.f32 %v1265_v0, %v1264_v30 }
 0x9b2   : > { %1572 = vmatmul.mubr.msk.f32.vlgmr.msra.gmra.mxu0 %vm711_vm2, %v1266_v31 }
 0xa72   : > { %v1347_v33 = vpop.f32.mrf.mxu0 }
 0xa73   : > { %v1348_v34 = vadd.f32 %v1466_v32, %v1347_v33 }
 0xa74   : > { %v1573_v35 = vpop.f32.mrf.mxu0 }
 0xa75   : > { %1351 = vst [vmem:[%s614_s21] sm:$0xff] %v1348_v34 }
 0xa76 PF: > { %s30_s27 = sadd.s32 1, %s1719_s27  }
 0xa77   : > { %p27_p2 = scmp.ge.s32.totalorder %s30_s27, 4  }
 0xa79   :  { %29 = sbr.rel (!%p27_p2) target bundleno = 6 (0x6), region = 135 }
 0xa7e   :  { %1371 = vsyncpa [#allocation3], 1 }
 0xa7f   :  { %1373 = vsyncpa [#allocation3 + $0x1], 1 }
 0xa80   :  { %1374 = vsyncpa [#allocation5], 1 }

</bundles_post_ra>
